<compile_context>
chip_gen: v6e
topology: v6e:2x2x1
jax: 0.10.0
libtpu: 0.0.40
codegen_flags: <defaults>
</compile_context>

<pallas_src>
import jax
import jax.numpy as jnp
from jax.experimental import pallas as pl
from jax.experimental.pallas import tpu as pltpu

_LANE = 128
_SUBLANE = 8


def _round_up(n, m):
    return ((n + m - 1) // m) * m


def _critic_kernel(x_ref, w_ref, b_ref, o_ref):
    # x_ref: (TB, d_in), w_ref: (d_in, d_pad), b_ref: (1, d_pad), o_ref: (TB, d_pad)
    acc = jnp.dot(x_ref[...], w_ref[...], preferred_element_type=jnp.float32)
    acc = acc + b_ref[...].astype(jnp.float32)
    o_ref[...] = jnp.maximum(acc, 0.0).astype(o_ref.dtype)


def critic_forward(x, w_pad, b_pad, d_vf, *,
                   batch_tile=1024,
                   small_batch_threshold=64,
                   batch_semantics="parallel",
                   pad_output=False):
    """ReLU(x @ w + b) critic head.

    * B <= small_batch_threshold: plain XLA (fuses with neighbors; the Pallas
      launch would be pure overhead at this size).
    * larger B: lane-dense Pallas kernel, 1-D grid over the batch axis with a
      ragged last block (no input padding), weights/bias VMEM-resident.
      `pad_output=True` skips the final 69-column slice and hands back the
      padded (B, 128) slab for the consumer to fuse.
    Output dtype follows x.dtype (pass bf16 x/w/b to halve DMA traffic;
    accumulation stays f32).
    """
    B, d_in = x.shape
    d_pad = w_pad.shape[1]
    out_dtype = x.dtype

    if B <= small_batch_threshold:
        y = jnp.dot(x, w_pad[:, :d_vf], preferred_element_type=jnp.float32)
        y = y + b_pad[:, :d_vf].astype(jnp.float32)
        return jnp.maximum(y, 0.0).astype(out_dtype)

    # Batch tile: never larger than the (sublane-rounded-down) batch so a block
    # never exceeds the array; the trailing ragged block is masked by Pallas.
    TB = min(batch_tile, (B // _SUBLANE) * _SUBLANE)
    grid = (pl.cdiv(B, TB),)

    cost = pl.CostEstimate(
        flops=2 * B * d_in * d_pad,
        transcendentals=0,
        bytes_accessed=(B * d_in * x.dtype.itemsize
                        + d_in * d_pad * w_pad.dtype.itemsize
                        + d_pad * b_pad.dtype.itemsize
                        + B * d_pad * out_dtype.itemsize),
    )

    # NOTE: w/b index_maps are constant (0,0) so they stay VMEM-resident; the
    # default double-buffering only costs an extra ~16 KiB, so we skip
    # pl.Buffered(1) to keep lowering maximally portable.
    # TODO(synk): on v7x pass batch_semantics=pltpu.CORE_PARALLEL (and a smaller
    # batch_tile so each TensorCore gets >=2-3 grid steps) to split the batch
    # axis across both cores.
    out = pl.pallas_call(
        _critic_kernel,
        out_shape=jax.ShapeDtypeStruct((B, d_pad), out_dtype),
        grid=grid,
        in_specs=[
            pl.BlockSpec((TB, d_in), lambda i: (i, 0)),
            pl.BlockSpec((d_in, d_pad), lambda i: (0, 0)),
            pl.BlockSpec((1, d_pad), lambda i: (0, 0)),
        ],
        out_specs=pl.BlockSpec((TB, d_pad), lambda i: (i, 0)),
        compiler_params=pltpu.CompilerParams(
            dimension_semantics=(batch_semantics,),
        ),
        cost_estimate=cost,
    )(x, w_pad, b_pad)

    if pad_output:
        return out
    return out[:, :d_vf]


class PassThroughObsPallas:
    """JAX/Pallas port of the PyTorch PassThroughObs module."""

    def __init__(self, d_in, last_layer_dim_pi=5, last_layer_dim_vf=64 + 5,
                 key=None, param_dtype=jnp.float32):
        self.latent_dim_pi = last_layer_dim_pi
        self.latent_dim_vf = last_layer_dim_vf
        if key is None:
            key = jax.random.PRNGKey(0)
        kw, kb = jax.random.split(key)
        # Deterministic synthetic init (matches nn.Linear's U(-1/sqrt(d_in), 1/sqrt(d_in))).
        bound = 1.0 / (float(d_in) ** 0.5)
        # Logical params stored (d_in, d_vf) so the kernel computes x @ W directly
        # (equivalent to PyTorch's x @ W_torch.T + b with W_torch (d_vf, d_in)).
        self.w = jax.random.uniform(kw, (d_in, last_layer_dim_vf),
                                    minval=-bound, maxval=bound, dtype=jnp.float32)
        self.b = jax.random.uniform(kb, (1, last_layer_dim_vf),
                                    minval=-bound, maxval=bound, dtype=jnp.float32)
        # Lane-dense padded copies for the kernel (zero lanes -> ReLU(0)=0).
        d_pad = _round_up(last_layer_dim_vf, _LANE)
        self.w_pad = jnp.pad(self.w, ((0, 0), (0, d_pad - last_layer_dim_vf))).astype(param_dtype)
        self.b_pad = jnp.pad(self.b, ((0, 0), (0, d_pad - last_layer_dim_vf))).astype(param_dtype)

    def forward_actor(self, features):
        # Identity passthrough — no compute, stays in plain JAX.
        return features

    def forward_critic(self, features, **kwargs):
        return critic_forward(features, self.w_pad, self.b_pad, self.latent_dim_vf, **kwargs)

    def forward(self, x):
        return (self.forward_actor(x), self.forward_critic(x))


if __name__ == "__main__":
    key = jax.random.PRNGKey(0)
    k_x, k_xb, k_p = jax.random.split(key, 3)

    d_in = 32
    model = PassThroughObsPallas(d_in, key=k_p)

    # --- tiny batch (the module's typical usage): fused XLA path -------------
    x = jax.random.normal(k_x, (8, d_in), dtype=jnp.float32)
    actor_out, critic_out = model.forward(x)
    jax.block_until_ready(actor_out)
    jax.block_until_ready(critic_out)
    ref = jnp.maximum(x @ model.w + model.b, 0.0)
    assert actor_out.shape == (8, d_in)
    assert critic_out.shape == (8, model.latent_dim_vf)
    assert jnp.allclose(actor_out, x)
    assert jnp.allclose(critic_out, ref, atol=1e-5, rtol=1e-5)

    # --- rollout-sized ragged batch (not a tile multiple): Pallas grid path ---
    B = 520
    xb = jax.random.normal(k_xb, (B, d_in), dtype=jnp.float32)
    crit_big = critic_forward(xb, model.w_pad, model.b_pad, model.latent_dim_vf,
                              batch_tile=256)
    jax.block_until_ready(crit_big)
    ref_big = jnp.maximum(xb @ model.w + model.b, 0.0)
    assert crit_big.shape == (B, model.latent_dim_vf)
    assert jnp.allclose(crit_big, ref_big, atol=1e-5, rtol=1e-5)

    # Padded-output variant: no post-kernel slice (consumer fuses the 69-col view).
    crit_pad = critic_forward(xb, model.w_pad, model.b_pad, model.latent_dim_vf,
                              batch_tile=256, pad_output=True)
    jax.block_until_ready(crit_pad)
    assert crit_pad.shape == (B, model.w_pad.shape[1])
    assert jnp.allclose(crit_pad[:, :model.latent_dim_vf], ref_big, atol=1e-5, rtol=1e-5)

    # --- bf16 DMA path (f32 MXU accumulation, bf16 loads/stores) --------------
    xb16 = xb.astype(jnp.bfloat16)
    w16 = model.w_pad.astype(jnp.bfloat16)
    b16 = model.b_pad.astype(jnp.bfloat16)
    crit16 = critic_forward(xb16, w16, b16, model.latent_dim_vf, batch_tile=256)
    jax.block_until_ready(crit16)
    ref16 = jnp.maximum(
        xb16.astype(jnp.float32) @ w16[:, :model.latent_dim_vf].astype(jnp.float32)
        + b16[:, :model.latent_dim_vf].astype(jnp.float32), 0.0)
    assert crit16.shape == (B, model.latent_dim_vf)
    assert jnp.allclose(crit16.astype(jnp.float32), ref16, atol=3e-2, rtol=3e-2)

    print("KERNEL_OK")
</pallas_src>

<mosaic_0001>
module attributes {stable_mosaic.version = 11 : i64} {
  func.func @_critic_kernel(%arg0: i32, %arg1: memref<256x32xf32, #tpu.memory_space<vmem>>, %arg2: memref<32x128xf32, #tpu.memory_space<vmem>>, %arg3: memref<1x128xf32, #tpu.memory_space<vmem>>, %arg4: memref<256x128xf32, #tpu.memory_space<vmem>>) attributes {dimension_semantics = [#tpu.dimension_semantics<parallel>], iteration_bounds = array<i64: 3>, scalar_prefetch = 0 : i64, scratch_operands = 0 : i64, tpu.core_type = #tpu.core_type<tc>, window_params = [{transform_indices = @transform_0, window_bounds = array<i64: 256, 32>}, {pipeline_mode = #tpu.pipeline_mode<synchronous>, transform_indices = @transform_1, window_bounds = array<i64: 32, 128>}, {pipeline_mode = #tpu.pipeline_mode<synchronous>, transform_indices = @transform_2, window_bounds = array<i64: 1, 128>}, {transform_indices = @transform_3, window_bounds = array<i64: 256, 128>}]} {
    %c0 = arith.constant 0 : index
    %c0_0 = arith.constant 0 : index
    %0 = vector.load %arg1[%c0, %c0_0] : memref<256x32xf32, #tpu.memory_space<vmem>>, vector<256x32xf32>
    %c0_1 = arith.constant 0 : index
    %c0_2 = arith.constant 0 : index
    %1 = vector.load %arg2[%c0_1, %c0_2] : memref<32x128xf32, #tpu.memory_space<vmem>>, vector<32x128xf32>
    %cst = arith.constant dense<0.000000e+00> : vector<256x128xf32>
    %2 = tpu.matmul %0, %1, %cst {dimension_numbers = #tpu.dot_dimension_numbers<[1], [0], [0], [1], [0, 0, 1, 1], [], []>} : vector<256x32xf32>, vector<32x128xf32>, vector<256x128xf32> -> vector<256x128xf32>
    %c0_3 = arith.constant 0 : index
    %c0_4 = arith.constant 0 : index
    %3 = vector.load %arg3[%c0_3, %c0_4] : memref<1x128xf32, #tpu.memory_space<vmem>>, vector<1x128xf32>
    %4 = vector.broadcast %3 : vector<1x128xf32> to vector<256x128xf32>
    %5 = arith.addf %2, %4 : vector<256x128xf32>
    %cst_5 = arith.constant 0.000000e+00 : f32
    %6 = vector.broadcast %cst_5 : f32 to vector<256x128xf32>
    %7 = arith.maximumf %5, %6 : vector<256x128xf32>
    %c0_6 = arith.constant 0 : index
    %c0_7 = arith.constant 0 : index
    %8 = vector.load %arg4[%c0_6, %c0_7] : memref<256x128xf32, #tpu.memory_space<vmem>>, vector<256x128xf32>
    tpu.vector_store %arg4[%c0_6, %c0_7], %7 {strides = array<i32>} : memref<256x128xf32, #tpu.memory_space<vmem>>, vector<256x128xf32>,
    return
  }
  func.func @transform_0(%arg0: i32) -> (i32, i32) {
    %c0_i32 = arith.constant 0 : i32
    %c0_i32_0 = arith.constant 0 : i32
    return %arg0, %c0_i32 : i32, i32
  }
  func.func @transform_1(%arg0: i32) -> (i32, i32) {
    %c0_i32 = arith.constant 0 : i32
    %c0_i32_0 = arith.constant 0 : i32
    %c0_i32_1 = arith.constant 0 : i32
    return %c0_i32, %c0_i32_0 : i32, i32
  }
  func.func @transform_2(%arg0: i32) -> (i32, i32) {
    %c0_i32 = arith.constant 0 : i32
    %c0_i32_0 = arith.constant 0 : i32
    %c0_i32_1 = arith.constant 0 : i32
    return %c0_i32, %c0_i32_0 : i32, i32
  }
  func.func @transform_3(%arg0: i32) -> (i32, i32) {
    %c0_i32 = arith.constant 0 : i32
    %c0_i32_0 = arith.constant 0 : i32
    return %arg0, %c0_i32 : i32, i32
  }
}

</mosaic_0001>

<bundles_post_ra>
// kernel: tpu_custom_call.1
= control target key start
LH: loop header
LB: loop body
LE: loop exit
PB: predicated region body
PF: predicated region fallthrough
CT: control target
= control target key end

     0   :  { %8 = vsyncpa [#allocation3], 0  ;;  %s1252_s0 = inlined_call_operand.vmem [shape: f32[520,32], index: 0, kind: input, shape index: {}]   ;;  %s1253_s1 = inlined_call_operand.vmem [shape: f32[32,128], index: 1, kind: input, shape index: {}]   ;;  %s1254_s2 = inlined_call_operand.vmem [shape: f32[1,128], index: 2, kind: input, shape index: {}]   ;;  %s1255_s3 = inlined_call_operand.hbm [shape: f32[520,128], index: 3, kind: output, shape index: {}]  }
   0x1   :  { %10 = vsyncpa [#allocation3 + $0x1], 0  ;;  %s982_s12 = smov 0   ;;  %s984_s13 = smov 0  }
   0x2   :  { %s986_s14 = smov 0   ;;  %s988_s15 = smov 0  }
   0x3 LB: > { %s1003_s16 = sadd.s32 4294967295, %s957_s15   ;;  %s707_s17 = sadd.s32 4294967294, %s957_s15   ;;  %s957_s15 = sphi %s988_s15, %s1261_s15   ;;  %s953_s14 = sphi %s986_s14, %s1260_s14   ;;  %s949_s13 = sphi %s984_s13, %s1259_s13   ;;  %s945_s12 = sphi %s982_s12, %s1258_s12  }
   0x4   : > { %s1007_s18 = sadd.s32 1, %s957_s15   ;;  %s91_s19 = sadd.s32 1, %s953_s14 }
   0x5   : > { %s88_s20 = ssub.s32 %s957_s15, %s1007_s18  ;;  %p101_p0 = scmp.ne.s32.totalorder %s953_s14, %s949_s13 }
   0x6   : > { %p89_p1 = scmp.eq.s32.totalorder %s88_s20, 0  ;;  %p102_p2 = scmp.eq.s32.totalorder %s1003_s16, 2 }
   0x7   : > { %p107_p3 = scmp.ne.s32.totalorder %s949_s13, %s945_s12  ;;  %p108_p4 = scmp.eq.s32.totalorder %s707_s17, 2 }
   0x8   : > { %s1018_s21 = scalar_select %p89_p1, %s953_s14, %s91_s19  }
   0x9   : > { %p1020_p5 = por %p102_p2, %p101_p0  ;;  %p1024_p6 = por %p108_p4, %p107_p3 }
   0xa   : > { %p710_p7 = scmp.ge.s32.totalorder %s957_s15, 1  ;;  %p149_p8 = scmp.lt.s32.totalorder %s957_s15, 4 }
   0xc   : > { %p150_p9 = pnand %p710_p7, %p149_p8 }
   0xd   : > { %s1037_s28 = sshll.u32 (!%p150_p9), %s1003_s16, 5  ;;  %s174_s11 = sand.u32 (!%p150_p9), 1, %s949_s13  }
   0xe   : > { %153 = sbr.rel (%p150_p9) target bundleno = 284 (0x11c), region = 32  ;;  %p182_p10 = scmp.lt.s32.totalorder (!%p150_p9), %s1037_s28, 64 }
   0xf   : > { %s711_s20 = sshll.u32 (!%p150_p9), %s174_s11, 8  ;;  %s1192_s25 = scalar_lea.sflag (!%p150_p9), [#allocation3], %s174_s11 }
  0x10   : > { %s1128_s24 = scalar_lea.vmem (!%p150_p9), [#allocation2], %s711_s20 }
  0x13   : > { %v231_v0 = vld [vmem:[%s1253_s1 + $0x18] sm:$0xff]  ;;  %v230_v1 = vld [vmem:[%s1253_s1 + $0x10] sm:$0xff]  ;;  %v229_v2 = vld [vmem:[%s1253_s1 + $0x8] sm:$0xff]  ;;  %s183_s4 = scalar_select %p182_p10, %s1037_s28, 64  ;;  %vm239_vm0 = vcmask 261120  }
  0x14   : > { %793 = vmatprep.subr.mxu0 %v231_v0  ;;  %849 = vmatprep.subr.mxu1 %v231_v0  ;;  %v228_v3 = vld [vmem:[%s1253_s1] sm:$0xff]  ;;  %s634_s26 = ssub.s32 (%p1020_p5), 65, %s1037_s28 }
  0x15   : > { %794 = vmatpush3.msra.mxu0 %v231_v0  ;;  %853 = vmatpush3.msra.mxu1 %v231_v0  ;;  %s713_s7 = sshll.u32 %s183_s4, 3  ;;  %v1120_v36 = vld [vmem:[%s1254_s2] ss:$0 sm:$0xff]  ;;  %p635_p11 = scmp.lt.s32.totalorder (%p1020_p5), %s634_s26, 32 }
  0x16   : > { %795 = vmatprep.subr.mxu0 %v230_v1  ;;  %850 = vmatprep.subr.mxu1 %v230_v1  ;;  %s1050_s10 = scalar_lea.vmem %s1252_s0, %s713_s7 }
  0x17   : > { %796 = vmatpush3.msra.mxu0 %v230_v1  ;;  %854 = vmatpush3.msra.mxu1 %v230_v1  ;;  %v196_v4 = vld [vmem:[%s1050_s10] sm:$0xff]  ;;  %v197_v6 = vld [vmem:[%s1050_s10 + $0x8] sm:$0xff]  ;;  %v198_v8 = vld [vmem:[%s1050_s10 + $0x10] sm:$0xff] }
  0x18   : > { %797 = vmatprep.subr.mxu0 %v229_v2  ;;  %851 = vmatprep.subr.mxu1 %v229_v2  ;;  %v212_v5 = vld [vmem:[%s1050_s10 + $0x80] sm:$0xff]  ;;  %v213_v7 = vld [vmem:[%s1050_s10 + $0x88] sm:$0xff]  ;;  %v214_v9 = vld [vmem:[%s1050_s10 + $0x90] sm:$0xff] }
  0x19   : > { %798 = vmatpush3.msra.mxu0 %v229_v2  ;;  %855 = vmatpush3.msra.mxu1 %v229_v2  ;;  %v199_v10 = vld [vmem:[%s1050_s10 + $0x18] sm:$0xff]  ;;  %v200_v12 = vld [vmem:[%s1050_s10 + $0x20] sm:$0xff]  ;;  %v201_v14 = vld [vmem:[%s1050_s10 + $0x28] sm:$0xff] }
  0x1a   : > { %799 = vmatprep.subr.mxu0 %v228_v3  ;;  %852 = vmatprep.subr.mxu1 %v228_v3  ;;  %v215_v11 = vld [vmem:[%s1050_s10 + $0x98] sm:$0xff]  ;;  %v216_v13 = vld [vmem:[%s1050_s10 + $0xa0] sm:$0xff]  ;;  %v217_v15 = vld [vmem:[%s1050_s10 + $0xa8] sm:$0xff] }
  0x1b   : > { %800 = vmatpush3.msra.mxu0 %v228_v3  ;;  %856 = vmatpush3.msra.mxu1 %v228_v3  ;;  %v202_v16 = vld [vmem:[%s1050_s10 + $0x30] sm:$0xff]  ;;  %v203_v18 = vld [vmem:[%s1050_s10 + $0x38] sm:$0xff]  ;;  %v204_v20 = vld [vmem:[%s1050_s10 + $0x40] sm:$0xff] }
  0x1c   : > { %801 = vmatprep.mubr.msk.f32.mxu0 %vm239_vm0, %v196_v4  ;;  %825 = vmatprep.mubr.msk.f32.mxu1 %vm239_vm0, %v212_v5  ;;  %v218_v17 = vld [vmem:[%s1050_s10 + $0xb0] sm:$0xff]  ;;  %v219_v19 = vld [vmem:[%s1050_s10 + $0xb8] sm:$0xff]  ;;  %v220_v21 = vld [vmem:[%s1050_s10 + $0xc0] sm:$0xff] }
  0x1d   : > { %802 = vmatmul.mubr.msk.f32.vlgmr.msra.gmra.mxu0 %vm239_vm0, %v197_v6  ;;  %826 = vmatmul.mubr.msk.f32.vlgmr.msra.gmra.mxu1 %vm239_vm0, %v213_v7  ;;  %v205_v22 = vld [vmem:[%s1050_s10 + $0x48] sm:$0xff]  ;;  %v206_v24 = vld [vmem:[%s1050_s10 + $0x50] sm:$0xff]  ;;  %v207_v26 = vld [vmem:[%s1050_s10 + $0x58] sm:$0xff] }
  0x1e   : > { %804 = vmatprep.mubr.msk.f32.mxu0 %vm239_vm0, %v198_v8  ;;  %828 = vmatprep.mubr.msk.f32.mxu1 %vm239_vm0, %v214_v9  ;;  %v221_v23 = vld [vmem:[%s1050_s10 + $0xc8] sm:$0xff]  ;;  %v222_v25 = vld [vmem:[%s1050_s10 + $0xd0] sm:$0xff]  ;;  %v223_v27 = vld [vmem:[%s1050_s10 + $0xd8] sm:$0xff] }
  0x1f   : > { %v208_v28 = vld [vmem:[%s1050_s10 + $0x60] sm:$0xff]  ;;  %v209_v30 = vld [vmem:[%s1050_s10 + $0x68] sm:$0xff]  ;;  %v210_v32 = vld [vmem:[%s1050_s10 + $0x70] sm:$0xff] }
  0x20   : > { %v224_v29 = vld [vmem:[%s1050_s10 + $0xe0] sm:$0xff]  ;;  %v225_v31 = vld [vmem:[%s1050_s10 + $0xe8] sm:$0xff]  ;;  %v226_v33 = vld [vmem:[%s1050_s10 + $0xf0] sm:$0xff] }
  0x21   : > { %805 = vmatmul.mubr.msk.f32.gmra.mxu0 %vm239_vm0, %v199_v10  ;;  %829 = vmatmul.mubr.msk.f32.gmra.mxu1 %vm239_vm0, %v215_v11  ;;  %v211_v34 = vld [vmem:[%s1050_s10 + $0x78] sm:$0xff] }
  0x22   : > { %807 = vmatprep.mubr.msk.f32.mxu0 %vm239_vm0, %v200_v12  ;;  %831 = vmatprep.mubr.msk.f32.mxu1 %vm239_vm0, %v216_v13  ;;  %v227_v35 = vld [vmem:[%s1050_s10 + $0xf8] sm:$0xff] }
  0x25   : > { %808 = vmatmul.mubr.msk.f32.gmra.mxu0 %vm239_vm0, %v201_v14  ;;  %832 = vmatmul.mubr.msk.f32.gmra.mxu1 %vm239_vm0, %v217_v15 }
  0x26   : > { %810 = vmatprep.mubr.msk.f32.mxu0 %vm239_vm0, %v202_v16  ;;  %834 = vmatprep.mubr.msk.f32.mxu1 %vm239_vm0, %v218_v17 }
  0x29   : > { %811 = vmatmul.mubr.msk.f32.gmra.mxu0 %vm239_vm0, %v203_v18  ;;  %835 = vmatmul.mubr.msk.f32.gmra.mxu1 %vm239_vm0, %v219_v19 }
  0x2a   : > { %813 = vmatprep.mubr.msk.f32.mxu0 %vm239_vm0, %v204_v20  ;;  %837 = vmatprep.mubr.msk.f32.mxu1 %vm239_vm0, %v220_v21 }
  0x2d   : > { %814 = vmatmul.mubr.msk.f32.gmra.mxu0 %vm239_vm0, %v205_v22  ;;  %838 = vmatmul.mubr.msk.f32.gmra.mxu1 %vm239_vm0, %v221_v23 }
  0x2e   : > { %816 = vmatprep.mubr.msk.f32.mxu0 %vm239_vm0, %v206_v24  ;;  %840 = vmatprep.mubr.msk.f32.mxu1 %vm239_vm0, %v222_v25 }
  0x31   : > { %817 = vmatmul.mubr.msk.f32.gmra.mxu0 %vm239_vm0, %v207_v26  ;;  %841 = vmatmul.mubr.msk.f32.gmra.mxu1 %vm239_vm0, %v223_v27 }
  0x32   : > { %819 = vmatprep.mubr.msk.f32.mxu0 %vm239_vm0, %v208_v28  ;;  %843 = vmatprep.mubr.msk.f32.mxu1 %vm239_vm0, %v224_v29 }
  0x35   : > { %820 = vmatmul.mubr.msk.f32.gmra.mxu0 %vm239_vm0, %v209_v30  ;;  %844 = vmatmul.mubr.msk.f32.gmra.mxu1 %vm239_vm0, %v225_v31 }
  0x36   : > { %822 = vmatprep.mubr.msk.f32.mxu0 %vm239_vm0, %v210_v32  ;;  %846 = vmatprep.mubr.msk.f32.mxu1 %vm239_vm0, %v226_v33 }
  0x39   : > { %823 = vmatmul.mubr.msk.f32.gmra.mxu0 %vm239_vm0, %v211_v34  ;;  %847 = vmatmul.mubr.msk.f32.gmra.mxu1 %vm239_vm0, %v227_v35 }
  0xdd   : > { %v803_v37 = vpop.f32.mrf.mxu0  ;;  %v827_v38 = vpop.f32.mrf.mxu1 }
  0xde   : > { %v408_v39 = vadd.f32 %v803_v37, %v1120_v36  ;;  %v488_v40 = vadd.f32 %v827_v38, %v1120_v36 }
  0xdf   : > { %v402_v41 = vpop.f32.mrf.mxu0  ;;  %v482_v42 = vpop.f32.mrf.mxu1 }
  0xe0   : > { %v562_v43 = vmax.f32 %v408_v39, 0.0  ;;  %v578_v44 = vmax.f32 %v488_v40, 0.0  ;;  %v403_v45 = vadd.f32 %v1120_v36, %v402_v41  ;;  %v483_v46 = vadd.f32 %v1120_v36, %v482_v42 }
  0xe1   : > { %v806_v47 = vpop.f32.mrf.mxu0  ;;  %v830_v48 = vpop.f32.mrf.mxu1 }
  0xe2   : > { %594 = vst [vmem:[%s1128_s24 + $0x8] sm:$0xff] %v562_v43  ;;  %610 = vst [vmem:[%s1128_s24 + $0x88] sm:$0xff] %v578_v44  ;;  %v561_v49 = vmax.f32 %v403_v45, 0.0  ;;  %v577_v50 = vmax.f32 %v483_v46, 0.0  ;;  %v418_v51 = vadd.f32 %v806_v47, %v1120_v36  ;;  %v498_v52 = vadd.f32 %v830_v48, %v1120_v36 }
  0xe3   : > { %v412_v53 = vpop.f32.mrf.mxu0  ;;  %v492_v54 = vpop.f32.mrf.mxu1 }
  0xe4   : > { %593 = vst [vmem:[%s1128_s24] sm:$0xff] %v561_v49  ;;  %609 = vst [vmem:[%s1128_s24 + $0x80] sm:$0xff] %v577_v50  ;;  %v564_v55 = vmax.f32 %v418_v51, 0.0  ;;  %v580_v56 = vmax.f32 %v498_v52, 0.0  ;;  %v413_v57 = vadd.f32 %v1120_v36, %v412_v53  ;;  %v493_v58 = vadd.f32 %v1120_v36, %v492_v54 }
  0xe5   : > { %v809_v59 = vpop.f32.mrf.mxu0  ;;  %v833_v60 = vpop.f32.mrf.mxu1 }
  0xe6   : > { %596 = vst [vmem:[%s1128_s24 + $0x18] sm:$0xff] %v564_v55  ;;  %612 = vst [vmem:[%s1128_s24 + $0x98] sm:$0xff] %v580_v56  ;;  %v563_v61 = vmax.f32 %v413_v57, 0.0  ;;  %v579_v62 = vmax.f32 %v493_v58, 0.0  ;;  %v428_v63 = vadd.f32 %v809_v59, %v1120_v36  ;;  %v508_v0 = vadd.f32 %v833_v60, %v1120_v36 }
  0xe7   : > { %v422_v1 = vpop.f32.mrf.mxu0  ;;  %v502_v2 = vpop.f32.mrf.mxu1 }
  0xe8   : > { %595 = vst [vmem:[%s1128_s24 + $0x10] sm:$0xff] %v563_v61  ;;  %611 = vst [vmem:[%s1128_s24 + $0x90] sm:$0xff] %v579_v62  ;;  %v566_v3 = vmax.f32 %v428_v63, 0.0  ;;  %v582_v4 = vmax.f32 %v508_v0, 0.0  ;;  %v423_v5 = vadd.f32 %v1120_v36, %v422_v1  ;;  %v503_v6 = vadd.f32 %v1120_v36, %v502_v2 }
  0xe9   : > { %v812_v7 = vpop.f32.mrf.mxu0  ;;  %v836_v8 = vpop.f32.mrf.mxu1 }
  0xea   : > { %598 = vst [vmem:[%s1128_s24 + $0x28] sm:$0xff] %v566_v3  ;;  %614 = vst [vmem:[%s1128_s24 + $0xa8] sm:$0xff] %v582_v4  ;;  %v565_v9 = vmax.f32 %v423_v5, 0.0  ;;  %v581_v10 = vmax.f32 %v503_v6, 0.0  ;;  %v438_v11 = vadd.f32 %v812_v7, %v1120_v36  ;;  %v518_v12 = vadd.f32 %v836_v8, %v1120_v36 }
  0xeb   : > { %v432_v13 = vpop.f32.mrf.mxu0  ;;  %v512_v14 = vpop.f32.mrf.mxu1 }
  0xec   : > { %597 = vst [vmem:[%s1128_s24 + $0x20] sm:$0xff] %v565_v9  ;;  %613 = vst [vmem:[%s1128_s24 + $0xa0] sm:$0xff] %v581_v10  ;;  %v568_v15 = vmax.f32 %v438_v11, 0.0  ;;  %v584_v16 = vmax.f32 %v518_v12, 0.0  ;;  %v433_v17 = vadd.f32 %v1120_v36, %v432_v13  ;;  %v513_v18 = vadd.f32 %v1120_v36, %v512_v14 }
  0xed   : > { %v815_v19 = vpop.f32.mrf.mxu0  ;;  %v839_v20 = vpop.f32.mrf.mxu1 }
  0xee   : > { %600 = vst [vmem:[%s1128_s24 + $0x38] sm:$0xff] %v568_v15  ;;  %616 = vst [vmem:[%s1128_s24 + $0xb8] sm:$0xff] %v584_v16  ;;  %v567_v21 = vmax.f32 %v433_v17, 0.0  ;;  %v583_v22 = vmax.f32 %v513_v18, 0.0  ;;  %v448_v23 = vadd.f32 %v815_v19, %v1120_v36  ;;  %v528_v24 = vadd.f32 %v839_v20, %v1120_v36 }
  0xef   : > { %v442_v25 = vpop.f32.mrf.mxu0  ;;  %v522_v26 = vpop.f32.mrf.mxu1 }
  0xf0   : > { %599 = vst [vmem:[%s1128_s24 + $0x30] sm:$0xff] %v567_v21  ;;  %615 = vst [vmem:[%s1128_s24 + $0xb0] sm:$0xff] %v583_v22  ;;  %v570_v27 = vmax.f32 %v448_v23, 0.0  ;;  %v586_v28 = vmax.f32 %v528_v24, 0.0  ;;  %v443_v29 = vadd.f32 %v1120_v36, %v442_v25  ;;  %v523_v30 = vadd.f32 %v1120_v36, %v522_v26 }
  0xf1   : > { %v818_v31 = vpop.f32.mrf.mxu0  ;;  %v842_v32 = vpop.f32.mrf.mxu1 }
  0xf2   : > { %602 = vst [vmem:[%s1128_s24 + $0x48] sm:$0xff] %v570_v27  ;;  %618 = vst [vmem:[%s1128_s24 + $0xc8] sm:$0xff] %v586_v28  ;;  %v569_v33 = vmax.f32 %v443_v29, 0.0  ;;  %v585_v34 = vmax.f32 %v523_v30, 0.0  ;;  %v458_v35 = vadd.f32 %v818_v31, %v1120_v36  ;;  %v538_v37 = vadd.f32 %v842_v32, %v1120_v36 }
  0xf3   : > { %v452_v38 = vpop.f32.mrf.mxu0  ;;  %v532_v39 = vpop.f32.mrf.mxu1 }
  0xf4   : > { %601 = vst [vmem:[%s1128_s24 + $0x40] sm:$0xff] %v569_v33  ;;  %617 = vst [vmem:[%s1128_s24 + $0xc0] sm:$0xff] %v585_v34  ;;  %v572_v40 = vmax.f32 %v458_v35, 0.0  ;;  %v588_v41 = vmax.f32 %v538_v37, 0.0  ;;  %v453_v42 = vadd.f32 %v1120_v36, %v452_v38  ;;  %v533_v43 = vadd.f32 %v1120_v36, %v532_v39 }
  0xf5   : > { %v821_v44 = vpop.f32.mrf.mxu0  ;;  %v845_v45 = vpop.f32.mrf.mxu1 }
  0xf6   : > { %604 = vst [vmem:[%s1128_s24 + $0x58] sm:$0xff] %v572_v40  ;;  %620 = vst [vmem:[%s1128_s24 + $0xd8] sm:$0xff] %v588_v41  ;;  %v571_v46 = vmax.f32 %v453_v42, 0.0  ;;  %v587_v47 = vmax.f32 %v533_v43, 0.0  ;;  %v468_v48 = vadd.f32 %v821_v44, %v1120_v36  ;;  %v548_v49 = vadd.f32 %v845_v45, %v1120_v36 }
  0xf7   : > { %v462_v50 = vpop.f32.mrf.mxu0  ;;  %v542_v51 = vpop.f32.mrf.mxu1 }
  0xf8   : > { %603 = vst [vmem:[%s1128_s24 + $0x50] sm:$0xff] %v571_v46  ;;  %619 = vst [vmem:[%s1128_s24 + $0xd0] sm:$0xff] %v587_v47  ;;  %v574_v52 = vmax.f32 %v468_v48, 0.0  ;;  %v590_v53 = vmax.f32 %v548_v49, 0.0  ;;  %v463_v54 = vadd.f32 %v1120_v36, %v462_v50  ;;  %v543_v55 = vadd.f32 %v1120_v36, %v542_v51 }
  0xf9   : > { %v824_v56 = vpop.f32.mrf.mxu0  ;;  %v848_v57 = vpop.f32.mrf.mxu1 }
  0xfa   : > { %606 = vst [vmem:[%s1128_s24 + $0x68] sm:$0xff] %v574_v52  ;;  %622 = vst [vmem:[%s1128_s24 + $0xe8] sm:$0xff] %v590_v53  ;;  %v573_v58 = vmax.f32 %v463_v54, 0.0  ;;  %v589_v59 = vmax.f32 %v543_v55, 0.0  ;;  %v478_v60 = vadd.f32 %v824_v56, %v1120_v36  ;;  %v558_v61 = vadd.f32 %v848_v57, %v1120_v36 }
  0xfb   : > { %v472_v62 = vpop.f32.mrf.mxu0  ;;  %v552_v63 = vpop.f32.mrf.mxu1 }
  0xfc   : > { %605 = vst [vmem:[%s1128_s24 + $0x60] sm:$0xff] %v573_v58  ;;  %621 = vst [vmem:[%s1128_s24 + $0xe0] sm:$0xff] %v589_v59  ;;  %v576_v0 = vmax.f32 %v478_v60, 0.0  ;;  %v592_v1 = vmax.f32 %v558_v61, 0.0  ;;  %v473_v2 = vadd.f32 %v1120_v36, %v472_v62  ;;  %v553_v3 = vadd.f32 %v1120_v36, %v552_v63  ;;  %632 = sbr.rel (!%p1020_p5) target bundleno = 284 (0x11c), region = 36 }
  0xfe   : > { %608 = vst [vmem:[%s1128_s24 + $0x78] sm:$0xff] %v576_v0  ;;  %624 = vst [vmem:[%s1128_s24 + $0xf8] sm:$0xff] %v592_v1  ;;  %v575_v4 = vmax.f32 %v473_v2, 0.0  ;;  %v591_v5 = vmax.f32 %v553_v3, 0.0 }
 0x100   : > { %607 = vst [vmem:[%s1128_s24 + $0x70] sm:$0xff] %v575_v4  ;;  %623 = vst [vmem:[%s1128_s24 + $0xf0] sm:$0xff] %v591_v5 }
 0x101   : > { %s1263_s26 = smov (!%p635_p11, %s634_s26), 32 }
 0x102   : > { %s1197_s27 = sshll.u32 %s1263_s26, 7 }
 0x103   : > { %s639_s29 = ssub.s32 4096, %s1197_s27 }
 0x104   : > { %640 = vsyncadd %s1192_s25, %s639_s29  ;;  %p750_p12 = scmp.ne.s32.totalorder %s1197_s27, 0  ;;  %s756_s30 = sshll.u32 %s1003_s16, 12 }
 0x105   : > { %s1206_s5 = scalar_lea.hbm %s1255_s3, %s756_s30  ;;  %s645_s28 = sshll.u32 %s1128_s24, 4  ;;  %s1209_s28 = int_to_ptr.vmem [resolvable:$true] %s645_s28 }
 0x106   : > { %s897_s6 = scalar_lea.vmem %s1209_s28, %s1197_s27  ;;  %s959_s7 = smov [#allocation2]  }
 0x107   : > { %p898_p13 = scmp.ne.s32.totalorder %s1209_s28, %s897_s6  ;;  %s901_s8 = sshll.u32 %s959_s7, 4  ;;  %s902_s8 = int_to_ptr.vmem [resolvable:$false] %s901_s8 }
 0x108   : > { %s903_s16 = scalar_lea.vmem %s902_s8, 8192  ;;  %p904_p2 = scmp.lt.s32.totalorder %s1209_s28, %s902_s8 }
 0x109   : > { %p899_p0 = pnand %p898_p13, %p750_p12  ;;  %p905_p3 = scmp.lt.s32.totalorder %s903_s16, %s897_s6 }
 0x10b   : > { %p900_p1 = pneg %p899_p0  ;;  %p906_p4 = por %p905_p3, %p904_p2 }
 0x10d   : > { %p907_p5 = pnand %p906_p4, %p900_p1 }
 0x10f   : > { %910 = shalt.err (!%p907_p5)
}
 0x110   : > { %s911_s9 = scalar_lea.hbm %s1206_s5, %s1197_s27  ;;  %s915_s17 = scalar_lea.hbm %s1255_s3, 8320 }
 0x111   : > { %p912_p7 = scmp.ne.s32.totalorder %s1206_s5, %s911_s9  ;;  %p916_p10 = scmp.lt.s32.totalorder %s1206_s5, %s1255_s3 }
 0x112   : > { %p917_p11 = scmp.lt.s32.totalorder %s915_s17, %s911_s9 }
 0x113   : > { %p913_p8 = pnand %p912_p7, %p750_p12 }
 0x114   : > { %p918_p13 = por %p917_p11, %p916_p10 }
 0x115   : > { %p914_p9 = pneg %p913_p8 }
 0x117   : > { %p919_p0 = pnand %p918_p13, %p914_p9 }
 0x119   : > { %922 = shalt.err (!%p919_p0)
}
 0x11a   : > { %s960_s24 = smov 128   ;;  %s961_s26 = smov 8  }
 0x11b   : > { %651 = dma.vmem_to_hbm [thread:$0]  (%p750_p12), %s1209_s28, %s1197_s27, %s1206_s5, %s1192_s25, %s960_s24, %s960_s24, %s961_s26  }
 0x11c PF: > { %p862_p1 = scmp.ge.s32.totalorder %s957_s15, 2  ;;  %s660_s29 = sand.u32 1, %s945_s12  }
 0x11d   : > { %s661_s30 = scalar_lea.sflag [#allocation3], %s660_s29 }
 0x11e   : > { %p859_p2 = pnand %p862_p1, %p1024_p6 }
 0x120   : > { %p860_p3 = pneg %p859_p2 }
 0x122   : > { %940 = dma.done.wait (%p860_p3), %s661_s30, 4096  }
 0x123   : > { %942 = vsyncadd (%p860_p3), %s661_s30, 4294963200  ;;  %p13_p4 = scmp.ge.s32.totalorder %s1007_s18, 5   ;;  %s1258_s12 = smov %s949_s13 }
 0x124   : > { %s1259_s13 = smov %s953_s14  ;;  %s1260_s14 = smov %s1018_s21 }
 0x125   : > { %s1261_s15 = smov %s1007_s18  ;;  %15 = sbr.rel (!%p13_p4) target bundleno = 3 (0x3), region = 67 }
 0x12a   :  { %666 = vsyncpa [#allocation3], 1 }
 0x12b   :  { %668 = vsyncpa [#allocation3 + $0x1], 1 }

</bundles_post_ra>
